<compile_context>
chip_gen: v5e
topology: v5e:2x2
jax: 0.10.0
libtpu: 0.0.40
codegen_flags: <defaults>
</compile_context>

<pallas_src>
import jax
import jax.numpy as jnp
from jax.experimental import pallas as pl
from jax.experimental.pallas import tpu as pltpu


def _entity_to_anchor_kernel(mean_ref, std_ref, w_ref, mo_ref, so_ref, out_ref):
    # mean_ref/std_ref : (TB, H)       -- one batch tile
    # w_ref/mo_ref/so_ref : (K, H)     -- same resident block every grid step
    # out_ref : (TB, K*3*H)            -- flat, lane-dense view of (TB, K, 3H)
    mean = mean_ref[...]
    std = std_ref[...]
    w = w_ref[...]
    mo = mo_ref[...]
    so = so_ref[...]

    tb = mean.shape[0]
    k_comp, h = w.shape
    out_dtype = out_ref.dtype

    # Static unroll over the (small) number of gaussian components. Each
    # component owns a contiguous 3*H lane range of the flat output row:
    #   [ weight_k | mean + mean_off_k | std + std_off_k ]
    for k in range(k_comp):
        base = k * 3 * h
        w_k = jnp.broadcast_to(w[k:k + 1, :], (tb, h))
        out_ref[:, base:base + h] = w_k.astype(out_dtype)
        out_ref[:, base + h:base + 2 * h] = (mean + mo[k:k + 1, :]).astype(out_dtype)
        out_ref[:, base + 2 * h:base + 3 * h] = (std + so[k:k + 1, :]).astype(out_dtype)


def _pick_block_rows(batch, hidden, num_comp, vmem_tile_budget_bytes):
    """Largest sublane-aligned row tile whose double-buffered VMEM fits budget."""
    # f32 bytes per batch row, double-buffered (x2): mean + std inputs and the
    # flat output row.
    bytes_per_row = 2 * 4 * (2 * hidden + 3 * num_comp * hidden)
    tb = max(8, vmem_tile_budget_bytes // max(1, bytes_per_row))
    tb = (tb // 8) * 8
    if tb >= batch:
        return batch  # single grid step; full-array block shape is always legal
    return tb


def entity_to_anchor(mean_emb, std_emb, weight_matrix, mean_offset, std_offset,
                     *, block_rows=None,
                     vmem_tile_budget_bytes=16 * 1024 * 1024):
    """Pallas implementation of EntityToAnchor.forward.

    mean_emb, std_emb: (B, H)
    weight_matrix, mean_offset, std_offset: (1, K, H)
    returns: (B, K, 3*H)
    """
    B, H = mean_emb.shape
    K = weight_matrix.shape[1]
    row_width = 3 * K * H

    # Squeeze the leading singleton on the parameters -> (K, H).
    w2 = weight_matrix.reshape(K, H)
    mo2 = mean_offset.reshape(K, H)
    so2 = std_offset.reshape(K, H)

    if block_rows is None:
        tb = _pick_block_rows(B, H, K, vmem_tile_budget_bytes)
    else:
        tb = block_rows
    tb = int(max(1, min(tb, B)))
    grid = (pl.cdiv(B, tb),)

    out_flat = pl.pallas_call(
        _entity_to_anchor_kernel,
        out_shape=jax.ShapeDtypeStruct((B, row_width), mean_emb.dtype),
        grid=grid,
        in_specs=[
            pl.BlockSpec((tb, H), lambda i: (i, 0)),
            pl.BlockSpec((tb, H), lambda i: (i, 0)),
            pl.BlockSpec((K, H), lambda i: (0, 0)),
            pl.BlockSpec((K, H), lambda i: (0, 0)),
            pl.BlockSpec((K, H), lambda i: (0, 0)),
        ],
        out_specs=pl.BlockSpec((tb, row_width), lambda i: (i, 0)),
        compiler_params=pltpu.CompilerParams(
            dimension_semantics=("parallel",),
            vmem_limit_bytes=32 * 1024 * 1024,
        ),
    )(mean_emb, std_emb, w2, mo2, so2)

    # Free contiguous view back to the module's (B, K, 3H) output layout.
    return out_flat.reshape(B, K, 3 * H)


def entity_to_anchor_ref(mean_emb, std_emb, weight_matrix, mean_offset, std_offset):
    """Pure-JAX reference mirroring the PyTorch forward."""
    B, H = mean_emb.shape
    K = weight_matrix.shape[1]
    w = jnp.broadcast_to(weight_matrix, (B, K, H))
    m = jnp.broadcast_to(mean_emb.reshape(B, 1, H) + mean_offset, (B, K, H))
    s = jnp.broadcast_to(std_emb.reshape(B, 1, H) + std_offset, (B, K, H))
    return jnp.concatenate([w, m, s], axis=-1)


if __name__ == "__main__":
    # Small shapes consistent with the module: batch=2, hidden_dim=32, K=4.
    B, H, K = 2, 32, 4

    key = jax.random.PRNGKey(0)
    k_mean, k_std, k_w, k_mo, k_so = jax.random.split(key, 5)
    mean_emb = jax.random.normal(k_mean, (B, H), dtype=jnp.float32)
    std_emb = jax.random.normal(k_std, (B, H), dtype=jnp.float32)

    # Deterministic parameter init matching __init__: weights = ones, offsets = zeros.
    weight_matrix = jnp.ones((1, K, H), dtype=jnp.float32)
    mean_offset = jnp.zeros((1, K, H), dtype=jnp.float32)
    std_offset = jnp.zeros((1, K, H), dtype=jnp.float32)

    out = jax.block_until_ready(
        entity_to_anchor(mean_emb, std_emb, weight_matrix, mean_offset, std_offset))
    ref = entity_to_anchor_ref(mean_emb, std_emb, weight_matrix, mean_offset, std_offset)
    assert out.shape == (B, K, 3 * H), out.shape
    assert jnp.allclose(out, ref, atol=1e-6), "mismatch vs reference (init params)"

    # Second check: non-trivial params and the multi-step tiled-grid path.
    B2 = 48
    mean2 = jax.random.normal(k_mean, (B2, H), dtype=jnp.float32)
    std2 = jax.random.normal(k_std, (B2, H), dtype=jnp.float32)
    wr = jax.random.normal(k_w, (1, K, H), dtype=jnp.float32)
    mor = jax.random.normal(k_mo, (1, K, H), dtype=jnp.float32)
    sor = jax.random.normal(k_so, (1, K, H), dtype=jnp.float32)
    out2 = jax.block_until_ready(
        entity_to_anchor(mean2, std2, wr, mor, sor, block_rows=16))
    ref2 = entity_to_anchor_ref(mean2, std2, wr, mor, sor)
    assert jnp.allclose(out2, ref2, atol=1e-6), "mismatch vs reference (tiled)"

    print("KERNEL_OK")
</pallas_src>

<mosaic_0001>
module attributes {stable_mosaic.version = 11 : i64} {
  func.func @_entity_to_anchor_kernel(%arg0: i32, %arg1: memref<2x32xf32, #tpu.memory_space<vmem>>, %arg2: memref<2x32xf32, #tpu.memory_space<vmem>>, %arg3: memref<4x32xf32, #tpu.memory_space<vmem>>, %arg4: memref<4x32xf32, #tpu.memory_space<vmem>>, %arg5: memref<4x32xf32, #tpu.memory_space<vmem>>, %arg6: memref<2x384xf32, #tpu.memory_space<vmem>>) attributes {dimension_semantics = [#tpu.dimension_semantics<parallel>], iteration_bounds = array<i64: 1>, scalar_prefetch = 0 : i64, scratch_operands = 0 : i64, tpu.core_type = #tpu.core_type<tc>, window_params = [{transform_indices = @transform_0, window_bounds = array<i64: 2, 32>}, {transform_indices = @transform_1, window_bounds = array<i64: 2, 32>}, {pipeline_mode = #tpu.pipeline_mode<synchronous>, transform_indices = @transform_2, window_bounds = array<i64: 4, 32>}, {pipeline_mode = #tpu.pipeline_mode<synchronous>, transform_indices = @transform_3, window_bounds = array<i64: 4, 32>}, {pipeline_mode = #tpu.pipeline_mode<synchronous>, transform_indices = @transform_4, window_bounds = array<i64: 4, 32>}, {transform_indices = @transform_5, window_bounds = array<i64: 2, 384>}]} {
    %c0 = arith.constant 0 : index
    %c0_0 = arith.constant 0 : index
    %0 = vector.load %arg1[%c0, %c0_0] : memref<2x32xf32, #tpu.memory_space<vmem>>, vector<2x32xf32>
    %c0_1 = arith.constant 0 : index
    %c0_2 = arith.constant 0 : index
    %1 = vector.load %arg2[%c0_1, %c0_2] : memref<2x32xf32, #tpu.memory_space<vmem>>, vector<2x32xf32>
    %c0_3 = arith.constant 0 : index
    %c0_4 = arith.constant 0 : index
    %2 = vector.load %arg3[%c0_3, %c0_4] : memref<4x32xf32, #tpu.memory_space<vmem>>, vector<4x32xf32>
    %c0_5 = arith.constant 0 : index
    %c0_6 = arith.constant 0 : index
    %3 = vector.load %arg4[%c0_5, %c0_6] : memref<4x32xf32, #tpu.memory_space<vmem>>, vector<4x32xf32>
    %c0_7 = arith.constant 0 : index
    %c0_8 = arith.constant 0 : index
    %4 = vector.load %arg5[%c0_7, %c0_8] : memref<4x32xf32, #tpu.memory_space<vmem>>, vector<4x32xf32>
    %5 = vector.extract_strided_slice %2 {offsets = [0, 0], sizes = [1, 32], strides = [1, 1]} : vector<4x32xf32> to vector<1x32xf32>
    %6 = vector.shape_cast %5 : vector<1x32xf32> to vector<1x32xf32>
    %7 = vector.broadcast %6 : vector<1x32xf32> to vector<2x32xf32>
    %c0_9 = arith.constant 0 : index
    %c0_10 = arith.constant 0 : index
    %8 = vector.load %arg6[%c0_9, %c0_10] : memref<2x384xf32, #tpu.memory_space<vmem>>, vector<2x32xf32>
    tpu.vector_store %arg6[%c0_9, %c0_10], %7 {strides = array<i32>} : memref<2x384xf32, #tpu.memory_space<vmem>>, vector<2x32xf32>,
    %9 = vector.extract_strided_slice %3 {offsets = [0, 0], sizes = [1, 32], strides = [1, 1]} : vector<4x32xf32> to vector<1x32xf32>
    %10 = vector.broadcast %9 : vector<1x32xf32> to vector<2x32xf32>
    %11 = arith.addf %0, %10 : vector<2x32xf32>
    %c0_11 = arith.constant 0 : index
    %c32 = arith.constant 32 : index
    %12 = vector.load %arg6[%c0_11, %c32] : memref<2x384xf32, #tpu.memory_space<vmem>>, vector<2x32xf32>
    tpu.vector_store %arg6[%c0_11, %c32], %11 {strides = array<i32>} : memref<2x384xf32, #tpu.memory_space<vmem>>, vector<2x32xf32>,
    %13 = vector.extract_strided_slice %4 {offsets = [0, 0], sizes = [1, 32], strides = [1, 1]} : vector<4x32xf32> to vector<1x32xf32>
    %14 = vector.broadcast %13 : vector<1x32xf32> to vector<2x32xf32>
    %15 = arith.addf %1, %14 : vector<2x32xf32>
    %c0_12 = arith.constant 0 : index
    %c64 = arith.constant 64 : index
    %16 = vector.load %arg6[%c0_12, %c64] : memref<2x384xf32, #tpu.memory_space<vmem>>, vector<2x32xf32>
    tpu.vector_store %arg6[%c0_12, %c64], %15 {strides = array<i32>} : memref<2x384xf32, #tpu.memory_space<vmem>>, vector<2x32xf32>,
    %17 = vector.extract_strided_slice %2 {offsets = [1, 0], sizes = [1, 32], strides = [1, 1]} : vector<4x32xf32> to vector<1x32xf32>
    %18 = vector.shape_cast %17 : vector<1x32xf32> to vector<1x32xf32>
    %19 = vector.broadcast %18 : vector<1x32xf32> to vector<2x32xf32>
    %c0_13 = arith.constant 0 : index
    %c96 = arith.constant 96 : index
    %20 = vector.load %arg6[%c0_13, %c96] : memref<2x384xf32, #tpu.memory_space<vmem>>, vector<2x32xf32>
    tpu.vector_store %arg6[%c0_13, %c96], %19 {strides = array<i32>} : memref<2x384xf32, #tpu.memory_space<vmem>>, vector<2x32xf32>,
    %21 = vector.extract_strided_slice %3 {offsets = [1, 0], sizes = [1, 32], strides = [1, 1]} : vector<4x32xf32> to vector<1x32xf32>
    %22 = vector.broadcast %21 : vector<1x32xf32> to vector<2x32xf32>
    %23 = arith.addf %0, %22 : vector<2x32xf32>
    %c0_14 = arith.constant 0 : index
    %c128 = arith.constant 128 : index
    %24 = vector.load %arg6[%c0_14, %c128] : memref<2x384xf32, #tpu.memory_space<vmem>>, vector<2x32xf32>
    tpu.vector_store %arg6[%c0_14, %c128], %23 {strides = array<i32>} : memref<2x384xf32, #tpu.memory_space<vmem>>, vector<2x32xf32>,
    %25 = vector.extract_strided_slice %4 {offsets = [1, 0], sizes = [1, 32], strides = [1, 1]} : vector<4x32xf32> to vector<1x32xf32>
    %26 = vector.broadcast %25 : vector<1x32xf32> to vector<2x32xf32>
    %27 = arith.addf %1, %26 : vector<2x32xf32>
    %c0_15 = arith.constant 0 : index
    %c160 = arith.constant 160 : index
    %28 = vector.load %arg6[%c0_15, %c160] : memref<2x384xf32, #tpu.memory_space<vmem>>, vector<2x32xf32>
    tpu.vector_store %arg6[%c0_15, %c160], %27 {strides = array<i32>} : memref<2x384xf32, #tpu.memory_space<vmem>>, vector<2x32xf32>,
    %29 = vector.extract_strided_slice %2 {offsets = [2, 0], sizes = [1, 32], strides = [1, 1]} : vector<4x32xf32> to vector<1x32xf32>
    %30 = vector.shape_cast %29 : vector<1x32xf32> to vector<1x32xf32>
    %31 = vector.broadcast %30 : vector<1x32xf32> to vector<2x32xf32>
    %c0_16 = arith.constant 0 : index
    %c192 = arith.constant 192 : index
    %32 = vector.load %arg6[%c0_16, %c192] : memref<2x384xf32, #tpu.memory_space<vmem>>, vector<2x32xf32>
    tpu.vector_store %arg6[%c0_16, %c192], %31 {strides = array<i32>} : memref<2x384xf32, #tpu.memory_space<vmem>>, vector<2x32xf32>,
    %33 = vector.extract_strided_slice %3 {offsets = [2, 0], sizes = [1, 32], strides = [1, 1]} : vector<4x32xf32> to vector<1x32xf32>
    %34 = vector.broadcast %33 : vector<1x32xf32> to vector<2x32xf32>
    %35 = arith.addf %0, %34 : vector<2x32xf32>
    %c0_17 = arith.constant 0 : index
    %c224 = arith.constant 224 : index
    %36 = vector.load %arg6[%c0_17, %c224] : memref<2x384xf32, #tpu.memory_space<vmem>>, vector<2x32xf32>
    tpu.vector_store %arg6[%c0_17, %c224], %35 {strides = array<i32>} : memref<2x384xf32, #tpu.memory_space<vmem>>, vector<2x32xf32>,
    %37 = vector.extract_strided_slice %4 {offsets = [2, 0], sizes = [1, 32], strides = [1, 1]} : vector<4x32xf32> to vector<1x32xf32>
    %38 = vector.broadcast %37 : vector<1x32xf32> to vector<2x32xf32>
    %39 = arith.addf %1, %38 : vector<2x32xf32>
    %c0_18 = arith.constant 0 : index
    %c256 = arith.constant 256 : index
    %40 = vector.load %arg6[%c0_18, %c256] : memref<2x384xf32, #tpu.memory_space<vmem>>, vector<2x32xf32>
    tpu.vector_store %arg6[%c0_18, %c256], %39 {strides = array<i32>} : memref<2x384xf32, #tpu.memory_space<vmem>>, vector<2x32xf32>,
    %41 = vector.extract_strided_slice %2 {offsets = [3, 0], sizes = [1, 32], strides = [1, 1]} : vector<4x32xf32> to vector<1x32xf32>
    %42 = vector.shape_cast %41 : vector<1x32xf32> to vector<1x32xf32>
    %43 = vector.broadcast %42 : vector<1x32xf32> to vector<2x32xf32>
    %c0_19 = arith.constant 0 : index
    %c288 = arith.constant 288 : index
    %44 = vector.load %arg6[%c0_19, %c288] : memref<2x384xf32, #tpu.memory_space<vmem>>, vector<2x32xf32>
    tpu.vector_store %arg6[%c0_19, %c288], %43 {strides = array<i32>} : memref<2x384xf32, #tpu.memory_space<vmem>>, vector<2x32xf32>,
    %45 = vector.extract_strided_slice %3 {offsets = [3, 0], sizes = [1, 32], strides = [1, 1]} : vector<4x32xf32> to vector<1x32xf32>
    %46 = vector.broadcast %45 : vector<1x32xf32> to vector<2x32xf32>
    %47 = arith.addf %0, %46 : vector<2x32xf32>
    %c0_20 = arith.constant 0 : index
    %c320 = arith.constant 320 : index
    %48 = vector.load %arg6[%c0_20, %c320] : memref<2x384xf32, #tpu.memory_space<vmem>>, vector<2x32xf32>
    tpu.vector_store %arg6[%c0_20, %c320], %47 {strides = array<i32>} : memref<2x384xf32, #tpu.memory_space<vmem>>, vector<2x32xf32>,
    %49 = vector.extract_strided_slice %4 {offsets = [3, 0], sizes = [1, 32], strides = [1, 1]} : vector<4x32xf32> to vector<1x32xf32>
    %50 = vector.broadcast %49 : vector<1x32xf32> to vector<2x32xf32>
    %51 = arith.addf %1, %50 : vector<2x32xf32>
    %c0_21 = arith.constant 0 : index
    %c352 = arith.constant 352 : index
    %52 = vector.load %arg6[%c0_21, %c352] : memref<2x384xf32, #tpu.memory_space<vmem>>, vector<2x32xf32>
    tpu.vector_store %arg6[%c0_21, %c352], %51 {strides = array<i32>} : memref<2x384xf32, #tpu.memory_space<vmem>>, vector<2x32xf32>,
    return
  }
  func.func @transform_0(%arg0: i32) -> (i32, i32) {
    %c0_i32 = arith.constant 0 : i32
    %c0_i32_0 = arith.constant 0 : i32
    return %arg0, %c0_i32 : i32, i32
  }
  func.func @transform_1(%arg0: i32) -> (i32, i32) {
    %c0_i32 = arith.constant 0 : i32
    %c0_i32_0 = arith.constant 0 : i32
    return %arg0, %c0_i32 : i32, i32
  }
  func.func @transform_2(%arg0: i32) -> (i32, i32) {
    %c0_i32 = arith.constant 0 : i32
    %c0_i32_0 = arith.constant 0 : i32
    %c0_i32_1 = arith.constant 0 : i32
    return %c0_i32, %c0_i32_0 : i32, i32
  }
  func.func @transform_3(%arg0: i32) -> (i32, i32) {
    %c0_i32 = arith.constant 0 : i32
    %c0_i32_0 = arith.constant 0 : i32
    %c0_i32_1 = arith.constant 0 : i32
    return %c0_i32, %c0_i32_0 : i32, i32
  }
  func.func @transform_4(%arg0: i32) -> (i32, i32) {
    %c0_i32 = arith.constant 0 : i32
    %c0_i32_0 = arith.constant 0 : i32
    %c0_i32_1 = arith.constant 0 : i32
    return %c0_i32, %c0_i32_0 : i32, i32
  }
  func.func @transform_5(%arg0: i32) -> (i32, i32) {
    %c0_i32 = arith.constant 0 : i32
    %c0_i32_0 = arith.constant 0 : i32
    return %arg0, %c0_i32 : i32, i32
  }
}

</mosaic_0001>

<bundles_post_ra>
// kernel: tpu_custom_call.1
= control target key start
LH: loop header
LB: loop body
LE: loop exit
PB: predicated region body
PF: predicated region fallthrough
CT: control target
= control target key end

     0   :  { %10 = vsyncpa [#allocation3], 0  ;;  %s409_s0 = inlined_call_operand.hbm [shape: f32[2,32], index: 0, kind: input, shape index: {}]   ;;  %s410_s1 = inlined_call_operand.hbm [shape: f32[2,32], index: 1, kind: input, shape index: {}]   ;;  %s411_s2 = inlined_call_operand.hbm [shape: f32[4,32], index: 2, kind: input, shape index: {}]   ;;  %s412_s3 = inlined_call_operand.hbm [shape: f32[4,32], index: 3, kind: input, shape index: {}]   ;;  %s413_s4 = inlined_call_operand.hbm [shape: f32[4,32], index: 4, kind: input, shape index: {}]   ;;  %s414_s5 = inlined_call_operand.hbm [shape: f32[2,384], index: 5, kind: output, shape index: {}]  }
   0x1   :  { %11 = vsyncpa [#allocation6], 0 }
   0x2   :  { %12 = vsyncpa [#allocation9], 0  ;;  %s30_s20 = sshll.u32 %s410_s1, 4  ;;  %s31_s20 = int_to_ptr.hbm [resolvable:$true] %s30_s20 }
   0x3   :  { %13 = vsyncpa [#allocation4], 0  ;;  %s346_s21 = smov [#allocation5]   ;;  %s52_s25 = sshll.u32 %s412_s3, 4  ;;  %s53_s25 = int_to_ptr.hbm [resolvable:$true] %s52_s25 }
   0x4   :  { %s32_s22 = sshll.u32 %s346_s21, 4  ;;  %s347_s26 = smov [#allocation8]   ;;  %s33_s22 = int_to_ptr.vmem [resolvable:$true] %s32_s22 }
   0x5   :  { %35 = dma.hbm_to_vmem [thread:$0]  %s31_s20, 32, %s33_s22, [#allocation6]  }
   0x6   :  { %s54_s27 = sshll.u32 %s347_s26, 4  ;;  %s19_s30 = sshll.u32 %s409_s0, 4  ;;  %s55_s27 = int_to_ptr.vmem [resolvable:$true] %s54_s27  ;;  %s20_s30 = int_to_ptr.hbm [resolvable:$true] %s19_s30 }
   0x7   :  { %57 = dma.hbm_to_vmem [thread:$0]  %s53_s25, 64, %s55_s27, [#allocation9]  }
   0x8   :  { %s41_s7 = sshll.u32 %s411_s2, 4  ;;  %s348_s8 = smov [#allocation2]   ;;  %s42_s7 = int_to_ptr.hbm [resolvable:$true] %s41_s7 }
   0x9   :  { %s21_s9 = sshll.u32 %s348_s8, 4  ;;  %s349_s3 = smov [#allocation7]   ;;  %s22_s9 = int_to_ptr.vmem [resolvable:$true] %s21_s9 }
   0xa   :  { %24 = dma.hbm_to_vmem [thread:$0]  %s20_s30, 32, %s22_s9, [#allocation3]  }
   0xb   :  { %s43_s10 = sshll.u32 %s349_s3, 4  ;;  %s63_s13 = sshll.u32 %s413_s4, 4  ;;  %s44_s10 = int_to_ptr.vmem [resolvable:$true] %s43_s10  ;;  %s64_s13 = int_to_ptr.hbm [resolvable:$true] %s63_s13 }
   0xc   :  { %46 = dma.hbm_to_vmem [thread:$0]  %s42_s7, 64, %s44_s10, [#allocation6]  }
   0xd   :  { %s350_s0 = smov [#allocation10]  }
   0xe   :  { %s65_s14 = sshll.u32 %s350_s0, 4  ;;  %s66_s14 = int_to_ptr.vmem [resolvable:$true] %s65_s14 }
   0xf   :  { %68 = dma.hbm_to_vmem [thread:$0]  %s64_s13, 64, %s66_s14, [#allocation9]  }
  0x10   :  { %338 = dma.done.wait [#allocation3], 32  }
  0x11   :  { %339 = vsyncadd [#allocation3], 4294967264 }
  0x12   :  { %340 = dma.done.wait [#allocation6], 96  }
  0x13   :  { %341 = vsyncadd [#allocation6], 4294967200 }
  0x14   :  { %342 = dma.done.wait [#allocation9], 128  }
  0x15   :  { %343 = vsyncadd [#allocation9], 4294967168  ;;  %vm95_vm0 = vcmask 254976   ;;  %v91_v0 = vld [vmem:[#allocation7] sm:$0xf]  ;;  %s351_s2 = smov 32  }
  0x16   :  { %v89_v1 = vld [vmem:[#allocation2] sm:$0x3]  ;;  %v92_v2 = vld [vmem:[#allocation8] sm:$0xf]  ;;  %v146_v3 = vperm.slane %v91_v0, 3  ;;  %v94_v4 = vperm.slane %v91_v0, 0 }
  0x17   :  { %v97_v5 = vperm.slane %v92_v2, 0  ;;  %v120_v6 = vperm.slane %v92_v2, 1  ;;  %v93_v7 = vld [vmem:[#allocation10] sm:$0xf]  ;;  %v130_v8 = vperm.slane %v91_v0, 2  ;;  %s352_s4 = smov 64  }
  0x18   :  { %148 = vrot.lane.b32.xlu1 %v146_v3, %s351_s2  ;;  %v105_v11 = vperm.slane %v93_v7, 0  ;;  %96 = vst.msk [vmem:[#allocation11] sm:$0x3] %vm95_vm0, %v94_v4  ;;  %v90_v12 = vld [vmem:[#allocation5] sm:$0x3]  ;;  %v152_v13 = vperm.slane %v92_v2, 3 }
  0x19   :  { %v98_v9 = vadd.f32 %v97_v5, %v89_v1  ;;  %v121_v10 = vadd.f32 %v120_v6, %v89_v1  ;;  %132 = vrot.lane.b32.xlu2 %v130_v8, %s352_s4  ;;  %v123_v14 = vperm.slane %v93_v7, 1  ;;  %v136_v18 = vperm.slane %v92_v2, 2  ;;  %s353_s15 = smov 96   ;;  %s354_s16 = smov [#allocation11]  }
  0x1a   :  { %v106_v15 = vadd.f32 %v105_v11, %v90_v12  ;;  %v153_v16 = vadd.f32 %v152_v13, %v89_v1  ;;  %v159_v19 = vperm.slane %v93_v7, 3  ;;  %v113_v22 = vperm.slane %v91_v0, 1  ;;  %s171_s17 = sshll.u32 %s354_s16, 4  ;;  %s173_s20 = sshll.u32 %s414_s5, 4  ;;  %s172_s17 = int_to_ptr.vmem [resolvable:$true] %s171_s17  ;;  %s174_s20 = int_to_ptr.hbm [resolvable:$true] %s173_s20 }
  0x1b   :  { %100 = vrot.lane.b32.xlu0 %v98_v9, %s351_s2  ;;  %122 = vst.msk [vmem:[#allocation11 + $0x2] sm:$0x3] %vm95_vm0, %v121_v10  ;;  %v124_v17 = vadd.f32 %v123_v14, %v90_v12  ;;  %v137_v20 = vadd.f32 %v136_v18, %v89_v1  ;;  %v143_v23 = vperm.slane %v93_v7, 2  ;;  %vm103_vm1 = vcmask 517376  }
  0x1c   :  { %v160_v21 = vadd.f32 %v159_v19, %v90_v12  ;;  %vm111_vm2 = vcmask 779776   ;;  %vm118_vm3 = vcmask 1042176  }
  0x1d   :  { %v144_v24 = vadd.f32 %v143_v23, %v90_v12 }
  0x1f   :  { %145 = vst.msk [vmem:[#allocation11 + $0x4] sm:$0x3] %vm95_vm0, %v144_v24 }
  0x20   :  { %108 = vrot.lane.b32.xlu1 %v106_v15, %s352_s4 }
  0x21   :  { %155 = vrot.lane.b32.xlu2 %v153_v16, %s352_s4 }
  0x23   :  { %126 = vrot.lane.b32.xlu0 %v124_v17, %s351_s2 }
  0x28   :  { %139 = vrot.lane.b32.xlu1 %v137_v20, %s353_s15 }
  0x29   :  { %162 = vrot.lane.b32.xlu2 %v160_v21, %s353_s15 }
  0x2b   :  { %115 = vrot.lane.b32.xlu0 %v113_v22, %s353_s15 }
  0x73   :  { %v133_v25 = vpop.permute.xlu2 %132 }
  0x7b   :  { %v156_v26 = vpop.permute.xlu2 %155 }
  0x83   :  { %v163_v28 = vpop.permute.xlu2 %162 }
  0x8a   :  { %v149_v27 = vpop.permute.xlu1 %148 }
  0x8b   :  { %151 = vst.msk [vmem:[#allocation11 + $0x4] sm:$0x3] %vm103_vm1, %v149_v27 }
  0x8c   :  { %158 = vst.msk [vmem:[#allocation11 + $0x4] sm:$0x3] %vm111_vm2, %v156_v26 }
  0x8d   :  { %v101_v29 = vpop.permute.xlu0 %100  ;;  %165 = vst.msk [vmem:[#allocation11 + $0x4] sm:$0x3] %vm118_vm3, %v163_v28 }
  0x8e   :  { %104 = vst.msk [vmem:[#allocation11] sm:$0x3] %vm103_vm1, %v101_v29 }
  0x92   :  { %v109_v30 = vpop.permute.xlu1 %108 }
  0x93   :  { %112 = vst.msk [vmem:[#allocation11] sm:$0x3] %vm111_vm2, %v109_v30 }
  0x95   :  { %v127_v31 = vpop.permute.xlu0 %126 }
  0x96   :  { %129 = vst.msk [vmem:[#allocation11 + $0x2] sm:$0x3] %vm103_vm1, %v127_v31 }
  0x97   :  { %135 = vst.msk [vmem:[#allocation11 + $0x2] sm:$0x3] %vm111_vm2, %v133_v25 }
  0x9a   :  { %v140_v32 = vpop.permute.xlu1 %139 }
  0x9b   :  { %142 = vst.msk [vmem:[#allocation11 + $0x2] sm:$0x3] %vm118_vm3, %v140_v32 }
  0x9d   :  { %v116_v33 = vpop.permute.xlu0 %115 }
  0x9e   :  { %119 = vst.msk [vmem:[#allocation11] sm:$0x3] %vm118_vm3, %v116_v33 }
  0x9f   :  { %176 = dma.vmem_to_hbm [thread:$0]  %s172_s17, 96, %s174_s20, [#allocation4]  }
  0xa0   :  { %344 = dma.done.wait [#allocation4], 96  }
  0xa1   :  { %345 = vsyncadd [#allocation4], 4294967200 }
  0xa2   :  { %181 = vsyncpa [#allocation3], 1 }
  0xa3   :  { %182 = vsyncpa [#allocation6], 1 }
  0xa4   :  { %183 = vsyncpa [#allocation9], 1 }
  0xa5   :  { %184 = vsyncpa [#allocation4], 1 }

</bundles_post_ra>
